<compile_context>
chip_gen: v6e
topology: v6e:2x2x1
jax: 0.10.0
libtpu: 0.0.40
codegen_flags: <defaults>
</compile_context>

<pallas_src>
import functools

import jax
import jax.numpy as jnp
from jax.experimental import pallas as pl
from jax.experimental.pallas import tpu as pltpu


def _round_up(x, m):
    return (x + m - 1) // m * m


def _ce_label_smooth_kernel(x_ref, t_ref, out_ref, *,
                            epsilon, num_classes, batch, block_rows):
    # x_ref:   (TB, C)       logits tile (native dtype) in VMEM
    # t_ref:   (TB, 1)       int32 labels tile in VMEM
    # out_ref: (1, 8, 128)   f32 lane-dense per-tile partial sum
    i = pl.program_id(0)

    x = x_ref[...]                                   # (TB, C), native dtype
    t = t_ref[...]                                   # (TB, 1), int32
    tb, c = x.shape

    # Row max / subtract in the native dtype (bf16-capable VPU on v6e/v7x);
    # upcast once for exp and the reductions.
    m = jnp.max(x, axis=1, keepdims=True)            # (TB, 1)
    shifted = (x - m).astype(jnp.float32)            # (TB, C) f32, <= 0, finite

    exp_s = jnp.exp(shifted)
    lse = jnp.log(jnp.sum(exp_s, axis=1, keepdims=True))        # (TB, 1)

    # Single fused weighted reduction:
    #   loss_row = lse - sum_c w_c * shifted_c,  w_c = eps/C + (1-eps)*[c == t]
    col_ids = jax.lax.broadcasted_iota(jnp.int32, (1, c), 1)     # (1, C), hoisted/small
    is_target = col_ids == t                                     # (TB, C) via broadcast
    if epsilon != 0.0:
        eps_over_c = epsilon / num_classes
        w = jnp.where(is_target, 1.0 - epsilon + eps_over_c, eps_over_c)
        weighted = jnp.sum(w * shifted, axis=1, keepdims=True)   # (TB, 1)
    else:
        # label_smooth=False: plain cross entropy, no smoothing work at all.
        weighted = jnp.sum(jnp.where(is_target, shifted, 0.0),
                           axis=1, keepdims=True)                # (TB, 1)
    loss_row = lse - weighted                                    # (TB, 1)

    # Ragged last batch tile: rows past the true batch may hold garbage/NaN from the
    # partially-filled block -> select with where (never multiply) so nothing leaks.
    row_ids = i * block_rows + jax.lax.broadcasted_iota(jnp.int32, (tb, 1), 0)
    loss_row = jnp.where(row_ids < batch, loss_row, 0.0)

    partial = jnp.sum(loss_row)                                  # f32 scalar
    out_ref[...] = jnp.full(out_ref.shape, partial, dtype=out_ref.dtype)


def cross_entropy_loss(inputs, targets, *, num_classes, epsilon=0.1,
                       label_smooth=True, block_rows=None):
    """inputs: (B, num_classes) logits (any float dtype); targets: (B,) int labels."""
    eps = float(epsilon) if label_smooth else 0.0
    B, C = inputs.shape
    assert C == num_classes

    SUBLANE, LANE = 8, 128

    # Row tile: ~1 MiB of native-dtype logits per buffer. The body materializes ~3-4
    # f32 full-tile temporaries plus the double-buffered input, so this keeps total
    # live VMEM comfortably under the scoped defaults on v5e/v6e/v7x.
    itemsize = jnp.dtype(inputs.dtype).itemsize
    row_bytes = max(C * itemsize, 1)
    if block_rows is None:
        tb = (1 * 1024 * 1024) // row_bytes
        tb = max(SUBLANE, min(512, (tb // SUBLANE) * SUBLANE))
    else:
        tb = max(SUBLANE, _round_up(int(block_rows), SUBLANE))
    tb = min(tb, _round_up(B, SUBLANE))

    nb = pl.cdiv(B, tb)

    t = targets.astype(jnp.int32).reshape(B, 1)

    kernel = functools.partial(
        _ce_label_smooth_kernel,
        epsilon=eps, num_classes=C, batch=B, block_rows=tb,
    )

    partials = pl.pallas_call(
        kernel,
        out_shape=jax.ShapeDtypeStruct((nb, SUBLANE, LANE), jnp.float32),
        grid=(nb,),
        in_specs=[
            # Class dim == full array dim C -> exempt from the 128-divisibility rule,
            # so no HBM padding copy is ever needed.
            pl.BlockSpec((tb, C), lambda i: (i, 0)),
            pl.BlockSpec((tb, 1), lambda i: (i, 0)),
        ],
        out_specs=pl.BlockSpec((1, SUBLANE, LANE), lambda i: (i, 0, 0)),
        compiler_params=pltpu.CompilerParams(
            dimension_semantics=("parallel",),
            vmem_limit_bytes=32 * 1024 * 1024),
    )(inputs, t)

    # Tiny final reduction over per-tile partials (nb elements) in the wrapper.
    return jnp.sum(partials[:, 0, 0]) / B


def _reference(inputs, targets, num_classes, epsilon):
    log_probs = jax.nn.log_softmax(inputs.astype(jnp.float32), axis=1)
    onehot = jax.nn.one_hot(targets, num_classes, dtype=jnp.float32)
    smoothed = (1.0 - epsilon) * onehot + epsilon / num_classes
    return jnp.sum(jnp.mean(-smoothed * log_probs, axis=0))


if __name__ == "__main__":
    key = jax.random.PRNGKey(0)

    # Case 1: small shapes consistent with the module (batch=8, num_classes=32).
    B, C = 8, 32
    k1, k2, k3, k4 = jax.random.split(key, 4)
    logits = jax.random.normal(k1, (B, C), dtype=jnp.float32)
    labels = jax.random.randint(k2, (B,), 0, C, dtype=jnp.int32)

    loss = cross_entropy_loss(logits, labels, num_classes=C, epsilon=0.1,
                              label_smooth=True)
    loss = jax.block_until_ready(loss)
    ref = _reference(logits, labels, C, 0.1)
    assert jnp.allclose(loss, ref, rtol=1e-5, atol=1e-5), (loss, ref)

    # Case 2: ragged shapes (unaligned C, ragged last batch tile, multi-tile grid,
    # and the eps=0 / label_smooth=False path). No host-side padding anywhere.
    B2, C2 = 20, 200
    logits2 = jax.random.normal(k3, (B2, C2), dtype=jnp.float32)
    labels2 = jax.random.randint(k4, (B2,), 0, C2, dtype=jnp.int32)

    loss2 = cross_entropy_loss(logits2, labels2, num_classes=C2, epsilon=0.1,
                               label_smooth=True, block_rows=8)
    loss2 = jax.block_until_ready(loss2)
    ref2 = _reference(logits2, labels2, C2, 0.1)
    assert jnp.allclose(loss2, ref2, rtol=1e-5, atol=1e-5), (loss2, ref2)

    loss3 = cross_entropy_loss(logits2, labels2, num_classes=C2, epsilon=0.1,
                               label_smooth=False, block_rows=8)
    loss3 = jax.block_until_ready(loss3)
    ref3 = _reference(logits2, labels2, C2, 0.0)
    assert jnp.allclose(loss3, ref3, rtol=1e-5, atol=1e-5), (loss3, ref3)

    print("KERNEL_OK")
</pallas_src>

<mosaic_0001>
module attributes {stable_mosaic.version = 11 : i64} {
  func.func @_ce_label_smooth_kernel(%arg0: i32, %arg1: memref<8x32xf32, #tpu.memory_space<vmem>>, %arg2: memref<8x1xi32, #tpu.memory_space<vmem>>, %arg3: memref<1x8x128xf32, #tpu.memory_space<vmem>>) attributes {dimension_semantics = [#tpu.dimension_semantics<parallel>], iteration_bounds = array<i64: 1>, scalar_prefetch = 0 : i64, scratch_operands = 0 : i64, tpu.core_type = #tpu.core_type<tc>, window_params = [{transform_indices = @transform_0, window_bounds = array<i64: 8, 32>}, {transform_indices = @transform_1, window_bounds = array<i64: 8, 1>}, {transform_indices = @transform_2, window_bounds = array<i64: 1, 8, 128>}]} {
    %c0 = arith.constant 0 : index
    %c0_0 = arith.constant 0 : index
    %0 = vector.load %arg1[%c0, %c0_0] : memref<8x32xf32, #tpu.memory_space<vmem>>, vector<8x32xf32>
    %c0_1 = arith.constant 0 : index
    %c0_2 = arith.constant 0 : index
    %1 = vector.load %arg2[%c0_1, %c0_2] : memref<8x1xi32, #tpu.memory_space<vmem>>, vector<8x1xi32>
    %cst = arith.constant dense<0xFF800000> : vector<8xf32>
    %2 = vector.multi_reduction <maximumf>, %0, %cst [1] : vector<8x32xf32> to vector<8xf32>
    %3 = vector.shape_cast %2 : vector<8xf32> to vector<8x1xf32>
    %4 = vector.broadcast %3 : vector<8x1xf32> to vector<8x32xf32>
    %5 = arith.subf %0, %4 : vector<8x32xf32>
    %6 = math.exp %5 : vector<8x32xf32>
    %cst_3 = arith.constant dense<0.000000e+00> : vector<8xf32>
    %7 = vector.multi_reduction <add>, %6, %cst_3 [1] : vector<8x32xf32> to vector<8xf32>
    %8 = vector.shape_cast %7 : vector<8xf32> to vector<8x1xf32>
    %9 = math.log %8 : vector<8x1xf32>
    %10 = tpu.iota {dimensions = array<i32: 1>} : vector<1x32xi32>
    %11 = vector.broadcast %10 : vector<1x32xi32> to vector<8x32xi32>
    %12 = vector.broadcast %1 : vector<8x1xi32> to vector<8x32xi32>
    %13 = arith.cmpi eq, %11, %12 : vector<8x32xi32>
    %cst_4 = arith.constant 0.903124988 : f32
    %cst_5 = arith.constant 3.125000e-03 : f32
    %14 = vector.broadcast %cst_4 : f32 to vector<8x32xf32>
    %15 = vector.broadcast %cst_5 : f32 to vector<8x32xf32>
    %16 = arith.select %13, %14, %15 : vector<8x32xi1>, vector<8x32xf32>
    %17 = arith.mulf %16, %5 : vector<8x32xf32>
    %cst_6 = arith.constant dense<0.000000e+00> : vector<8xf32>
    %18 = vector.multi_reduction <add>, %17, %cst_6 [1] : vector<8x32xf32> to vector<8xf32>
    %19 = vector.shape_cast %18 : vector<8xf32> to vector<8x1xf32>
    %20 = arith.subf %9, %19 : vector<8x1xf32>
    %c8_i32 = arith.constant 8 : i32
    %21 = arith.muli %arg0, %c8_i32 : i32
    %22 = tpu.iota {dimensions = array<i32: 0>} : vector<8x1xi32>
    %23 = vector.broadcast %21 : i32 to vector<8x1xi32>
    %24 = arith.addi %23, %22 : vector<8x1xi32>
    %c8_i32_7 = arith.constant 8 : i32
    %25 = vector.broadcast %c8_i32_7 : i32 to vector<8x1xi32>
    %26 = arith.cmpi slt, %24, %25 : vector<8x1xi32>
    %cst_8 = arith.constant 0.000000e+00 : f32
    %27 = vector.broadcast %cst_8 : f32 to vector<8x1xf32>
    %28 = arith.select %26, %20, %27 : vector<8x1xi1>, vector<8x1xf32>
    %29 = vector.shape_cast %28 : vector<8x1xf32> to vector<1x8x1xf32>
    %cst_9 = arith.constant dense<0.000000e+00> : vector<1xf32>
    %30 = vector.multi_reduction <add>, %29, %cst_9 [1, 2] : vector<1x8x1xf32> to vector<1xf32>
    %31 = vector.shape_cast %30 : vector<1xf32> to vector<1x1x1xf32>
    %32 = vector.extract %31[0, 0, 0] : f32 from vector<1x1x1xf32>
    %33 = vector.broadcast %32 : f32 to vector<1x8x128xf32>
    %c0_10 = arith.constant 0 : index
    %c0_11 = arith.constant 0 : index
    %c0_12 = arith.constant 0 : index
    %34 = vector.load %arg3[%c0_10, %c0_11, %c0_12] : memref<1x8x128xf32, #tpu.memory_space<vmem>>, vector<1x8x128xf32>
    tpu.vector_store %arg3[%c0_10, %c0_11, %c0_12], %33 {strides = array<i32>} : memref<1x8x128xf32, #tpu.memory_space<vmem>>, vector<1x8x128xf32>,
    return
  }
  func.func @transform_0(%arg0: i32) -> (i32, i32) {
    %c0_i32 = arith.constant 0 : i32
    %c0_i32_0 = arith.constant 0 : i32
    return %arg0, %c0_i32 : i32, i32
  }
  func.func @transform_1(%arg0: i32) -> (i32, i32) {
    %c0_i32 = arith.constant 0 : i32
    %c0_i32_0 = arith.constant 0 : i32
    return %arg0, %c0_i32 : i32, i32
  }
  func.func @transform_2(%arg0: i32) -> (i32, i32, i32) {
    %c0_i32 = arith.constant 0 : i32
    %c0_i32_0 = arith.constant 0 : i32
    %c0_i32_1 = arith.constant 0 : i32
    return %arg0, %c0_i32, %c0_i32_0 : i32, i32, i32
  }
}

</mosaic_0001>

<bundles_post_ra>
// kernel: tpu_custom_call.1
= control target key start
LH: loop header
LB: loop body
LE: loop exit
PB: predicated region body
PF: predicated region fallthrough
CT: control target
= control target key end

     0   :  { %vm14_vm0 = vcmask 261120   ;;  %s134_s0 = inlined_call_operand.vmem [shape: f32[8,32], index: 0, kind: input, shape index: {}]   ;;  %s135_s1 = inlined_call_operand.vmem [shape: s32[8,1], index: 1, kind: input, shape index: {}]   ;;  %s136_s2 = inlined_call_operand.hbm [shape: f32[1,8,128], index: 2, kind: output, shape index: {}]  }
   0x1   :  { %v12_v0 = vld [vmem:[%s134_s0] sm:$0xff] }
   0x2   :  { %7 = vsyncpa [#allocation3], 0  ;;  %v15_v1 = vsel %vm14_vm0, %v12_v0, -inf  ;;  %v104_v2 = vmov 0   ;;  %v13_v3 = vld [vmem:[%s135_s1] sm:$0xff]  ;;  %v26_v7 = vlaneseq  ;;  %vm45_vm2 = vcmask 7168  }
   0x3   :  { %77 = vset.pattern.permute.xlu0 %v104_v2  ;;  %v105_v10 = vmov 0.003125   ;;  %s106_s0 = smov [#allocation2]  }
   0x4   :  { %16 = vmax.xlane.f32.xlu0 %v15_v1  ;;  %v27_v8 = vand.u32 127, %v26_v7  ;;  %s64_s1 = sshll.u32 %s106_s0, 4  ;;  %s65_s1 = int_to_ptr.vmem [resolvable:$true] %s64_s1 }
   0x5   :  { %s82_s14 = scalar_lea.vmem %s65_s1, 128  ;;  %p87_p1 = scmp.lt.s32.totalorder %s65_s1, %s65_s1 }
   0x6   :  { %p83_p0 = scmp.ne.s32.totalorder %s65_s1, %s82_s14  ;;  %p88_p2 = scmp.lt.s32.totalorder %s82_s14, %s82_s14 }
   0x8   :  { %p89_p3 = por %p88_p2, %p87_p1 }
   0xa   :  { %p90_p4 = pnand %p89_p3, %p83_p0 }
  0x1a   :  { %29 = vperm.xlu0 %77, %v13_v3  }
  0x8d   :  { %v17_v4 = vpop.xlane.xlu0 %16 }
  0x8e   :  { %v18_v5 = vsub.f32 %v12_v0, %v17_v4 }
  0x90   :  { %v19_v6 = vmul.f32 1.442695, %v18_v5 }
  0x92   :  { %78 = vpow2.f32 %v19_v6 }
  0x95   :  { %v30_v9 = vpop.permute.xlu0 %29 }
  0x96   :  { %vm31_vm1 = vcmp.eq.s32.totalorder %v27_v8, %v30_v9 }
  0x97   :  { %v32_v11 = vsel %vm31_vm1, 0.903125, %v105_v10 }
  0x98   :  { %v33_v14 = vmul.f32 %v32_v11, %v18_v5 }
  0x9a   :  { %v34_v15 = vsel %vm14_vm0, %v33_v14, 0.0 }
  0x9f   :  { %v79_v12 = vpop.eup %78 }
  0xa0   :  { %v21_v13 = vsel %vm14_vm0, %v79_v12, 0.0 }
  0xa1   :  { %22 = vadd.xlane.f32.xlu1 %v21_v13 }
  0xa5   :  { %35 = vadd.xlane.f32.xlu1 %v34_v15 }
 0x12a   :  { %v23_v16 = vpop.xlane.xlu1 %22 }
 0x12b   :  { %80 = vlog2.f32 %v23_v16 }
 0x12e   :  { %v36_v19 = vpop.xlane.xlu1 %35 }
 0x138   :  { %v81_v17 = vpop.eup %80 }
 0x139   :  { %v25_v18 = vmul.f32 0.6931472, %v81_v17 }
 0x13b   :  { %v37_v20 = vsub.f32 %v25_v18, %v36_v19 }
 0x13d   :  { %v46_v21 = vsel %vm45_vm2, %v37_v20, 0.0 }
 0x13e   :  { %47 = vadd.xlane.f32.xlu1 %v46_v21 }
 0x1c7   :  { %v48_v22 = vpop.xlane.xlu1 %47 }
 0x1c8   :  { %v49_v23 = vrot.slane %v48_v22, 4 }
 0x1ca   :  { %v50_v24 = vadd.f32 %v49_v23, %v48_v22 }
 0x1cc   :  { %v51_v25 = vrot.slane %v50_v24, 2 }
 0x1ce   :  { %v52_v26 = vadd.f32 %v51_v25, %v50_v24 }
 0x1d0   :  { %v53_v27 = vrot.slane %v52_v26, 1 }
 0x1d2   :  { %v54_v28 = vadd.f32 %v53_v27, %v52_v26 }
 0x1d4   :  { %72 = vpush %v54_v28 }
 0x205   :  { %s73_s13 = spop %72 }
 0x206   :  { %v56_v29 = vstv %s73_s13 }
 0x207   :  { %57 = vst [vmem:[#allocation2] sm:$0xff] %v56_v29 }
 0x208   :  { %93 = shalt.err (!%p90_p4)
}
 0x209   :  { %67 = dma.vmem_to_hbm [thread:$0]  %s65_s1, 128, %s136_s2, [#allocation3]  }
 0x20a   :  { %102 = dma.done.wait [#allocation3], 128  }
 0x20b   :  { %103 = vsyncadd [#allocation3], 4294967168 }
 0x20c   :  { %71 = vsyncpa [#allocation3], 1 }

</bundles_post_ra>
